<compile_context>
chip_gen: v6e
topology: v6e:2x2x1
jax: 0.10.0
libtpu: 0.0.40
codegen_flags: <defaults>
</compile_context>

<pallas_src>
import functools

import jax
import jax.numpy as jnp
from jax.experimental import pallas as pl
from jax.experimental.pallas import tpu as pltpu


def _round_up(x, m):
    return (x + m - 1) // m * m


def _lane_tile(block, total, phase):
    """Repeat `block` (rows, c) along lanes; return lanes [phase, phase+total).

    Built with a two-level concatenate so the operand count stays small even
    for small channel counts.  Used only for the (tiny) halo fills.
    """
    c = block.shape[-1]
    reps = -(-min(total + phase, max(128, c)) // c)
    tile = jnp.concatenate([block] * reps, axis=-1) if reps > 1 else block
    tw = tile.shape[-1]
    outer = -(-(total + phase) // tw)
    full = jnp.concatenate([tile] * outer, axis=-1) if outer > 1 else tile
    if phase == 0 and full.shape[-1] == total:
        return full
    return full[:, phase:phase + total]


def _window_sum(region, kernel_size, stride, delta):
    """wsum[:, r] = sum_{k<K} region[:, r + delta + k*stride].

    Binary-doubling scheme: builds partial sums P_m (m = 1,2,4,...) with one
    roll+add per level and combines the set bits of K, so the per-chunk cost
    is O(log2 K) roll/add passes instead of K.  Rolls are circular; wrapped
    lanes only ever land in lanes >= chunk which are never stored.
    """
    rw = region.shape[-1]

    def shift_down(v, s):               # y[:, r] = v[:, r + s]   (circular)
        if s % rw == 0:
            return v
        return pltpu.roll(v, (-s) % rw, axis=1)

    p = region                          # P_1
    m = 1
    covered = 0
    result = None
    while m <= kernel_size:
        if kernel_size & m:
            term = shift_down(p, delta + covered * stride)
            result = term if result is None else result + term
            covered += m
        if 2 * m <= kernel_size:
            p = p + shift_down(p, m * stride)   # P_m -> P_2m
        m *= 2
    return result


def _series_decomp_kernel(x_ref, res_ref, mean_ref, xpad_ref, *, kernel_size,
                          n_channels, width, chunk, left, delta, region_w,
                          row_group, right_fill):
    """One (row_tile, L*C) block: trend = edge-replicated moving average,
    residual = x - trend.

    x_ref    : (R, W)   flattened (time-major, channel-minor) input block
    res_ref  : (R, W)   residual output block
    mean_ref : (R, W)   moving-average output block
    xpad_ref : (R, Ws)  VMEM scratch: [left-halo | x | right-halo/filler]
                        with the interior starting at a 128-aligned offset.
    """
    c = n_channels
    w = width

    # ---- stage the edge-replicated, lane-aligned padded copy in VMEM ------
    # Interior copy starts at `left` (a multiple of 128): pure vld/vst, no
    # lane realignment.  Halo fills are one wide tiled store per side.
    xpad_ref[:, left:left + w] = x_ref[...]
    if left > 0:
        front = x_ref[:, 0:c]                       # first time step
        xpad_ref[:, 0:left] = _lane_tile(front, left, (-delta) % c)
    if right_fill > 0:
        back = x_ref[:, w - c:w]                    # last time step
        xpad_ref[:, left + w:left + w + right_fill] = _lane_tile(
            back, right_fill, 0)

    inv_k = 1.0 / kernel_size
    rows = x_ref.shape[0]
    n_chunks = -(-w // chunk)

    # Inner loops over sublane row groups and lane chunks keep the live f32
    # working set (~3-4 arrays of (row_group, region_w)) within the vreg file.
    for rg in range(0, rows, row_group):
        for ci in range(n_chunks):
            base = ci * chunk                       # multiple of 128
            cw = min(chunk, w - base)
            region = xpad_ref[rg:rg + row_group,
                              base:base + region_w].astype(jnp.float32)
            wsum = _window_sum(region, kernel_size, c, delta)
            mean = wsum[:, :cw] * inv_k
            x_blk = x_ref[rg:rg + row_group, base:base + cw].astype(jnp.float32)
            mean_ref[rg:rg + row_group, base:base + cw] = mean.astype(
                mean_ref.dtype)
            res_ref[rg:rg + row_group, base:base + cw] = (x_blk - mean).astype(
                res_ref.dtype)


def _vmem_budget():
    """(block byte target, vmem_limit_bytes) tuned per TPU generation."""
    cap = 0
    try:
        info = pltpu.get_tpu_info()
        cap = getattr(info, "vmem_capacity_bytes", 0) or 0
    except Exception:
        cap = 0
    if cap and cap > (96 << 20):
        # 128 MiB VMEM parts (v5e/v6e): larger blocks amortize per-step cost.
        return (4 << 20), (64 << 20)
    # 64 MiB VMEM parts (v7x-class) or unknown: stay conservative.
    return (1 << 20), (32 << 20)


def _pick_row_tile(batch, row_bytes, rgrp, target_bytes):
    """Rows per grid step: multiple of the dtype sublane packing, sized to
    ~target_bytes, preferring >= 4 grid steps (>= 2 per core on dual-TC)."""
    cap = max(rgrp, (target_bytes // max(row_bytes, 1)) // rgrp * rgrp)
    rt = min(cap, _round_up(batch, rgrp))
    while rt > rgrp and -(-batch // rt) < 4:
        rt -= rgrp
    return max(rt, rgrp)


def _pick_chunk(width, ext, rgrp):
    """Lane-chunk width: a multiple of 128 sized so a few live
    (row_group, chunk+ext) f32 arrays stay within the 64-vreg file."""
    budget = (10 * 128 * 8) // rgrp      # lanes per live array per row group
    chunk = max(128, ((budget - ext) // 128) * 128)
    return min(chunk, _round_up(width, 128))


def series_decomposition(x, kernel_size):
    """x: (B, L, C) -> (res, moving_mean), both (B, L, C).

    Matches PyTorch SeriesDecomposition(kernel_size): MovingAvg with stride=1
    and edge replication, then res = x - moving_mean.  Requires odd
    kernel_size (as the PyTorch module implicitly does, else L_out != L).
    """
    if kernel_size < 1 or kernel_size % 2 != 1:
        raise ValueError("SeriesDecomposition requires an odd kernel_size "
                         "(res = x - moving_mean needs L_out == L).")
    b, l, c = x.shape
    pad = (kernel_size - 1) // 2
    w = l * c
    x2 = x.reshape(b, w)                 # free reshape: time-major lanes

    pad_c = pad * c
    left = _round_up(pad_c, 128)         # 128-aligned left halo width
    delta = left - pad_c                 # folded into the roll shifts
    ext = _round_up(delta + (kernel_size - 1) * c, 128) if pad_c else 0

    itemsize = x.dtype.itemsize
    rgrp = max(8, 32 // max(itemsize, 1))    # 8 f32 / 16 bf16 / 32 int8 rows
    chunk = _pick_chunk(w, ext, rgrp)
    n_chunks = pl.cdiv(w, chunk)
    region_w = chunk + ext
    ws = n_chunks * chunk + ext              # scratch lane width
    right_fill = min(ws - left - w, _round_up(pad_c, 128)) if pad_c else 0

    target_bytes, vmem_limit = _vmem_budget()
    row_tile = _pick_row_tile(b, (w + ws) * itemsize, rgrp, target_bytes)

    kernel = functools.partial(
        _series_decomp_kernel,
        kernel_size=kernel_size, n_channels=c, width=w, chunk=chunk,
        left=left, delta=delta, region_w=region_w, row_group=rgrp,
        right_fill=right_fill)

    block = pl.BlockSpec((row_tile, w), lambda i: (i, 0))

    res2, mean2 = pl.pallas_call(
        kernel,
        out_shape=(jax.ShapeDtypeStruct((b, w), x.dtype),
                   jax.ShapeDtypeStruct((b, w), x.dtype)),
        grid=(pl.cdiv(b, row_tile),),
        in_specs=[block],
        out_specs=(block, block),
        scratch_shapes=[pltpu.VMEM((row_tile, ws), x.dtype)],
        compiler_params=pltpu.CompilerParams(
            dimension_semantics=("parallel",),
            vmem_limit_bytes=vmem_limit),
    )(x2)

    return res2.reshape(b, l, c), mean2.reshape(b, l, c)


def _reference(x, kernel_size):
    # Pure-JAX reference mirroring the PyTorch module.
    pad = (kernel_size - 1) // 2
    front = jnp.repeat(x[:, :1, :], pad, axis=1)
    end = jnp.repeat(x[:, -1:, :], pad, axis=1)
    xp = jnp.concatenate([front, x, end], axis=1)
    l = x.shape[1]
    mean = jnp.stack(
        [jnp.mean(xp[:, t:t + kernel_size, :], axis=1) for t in range(l)],
        axis=1)
    return x - mean, mean


if __name__ == "__main__":
    key = jax.random.PRNGKey(0)
    k1, k2 = jax.random.split(key)

    def check(k, B, L, C, K):
        x = jax.random.normal(k, (B, L, C), dtype=jnp.float32)
        res, mean = series_decomposition(x, K)
        res = jax.block_until_ready(res)
        mean = jax.block_until_ready(mean)
        res_ref, mean_ref = _reference(x, K)
        assert res.shape == res_ref.shape and mean.shape == mean_ref.shape
        assert jnp.allclose(mean, mean_ref, atol=1e-4, rtol=1e-4), "mean mismatch"
        assert jnp.allclose(res, res_ref, atol=1e-4, rtol=1e-4), "res mismatch"

    # Typical Autoformer window; exercises batch tiling (grid of 2 row tiles).
    check(k1, 16, 48, 8, 25)
    # Longer series; exercises the multi-chunk lane loop and the tail chunk.
    check(k2, 8, 160, 8, 5)

    print("KERNEL_OK")
</pallas_src>

<mosaic_0001>
module attributes {stable_mosaic.version = 11 : i64} {
  func.func @_series_decomp_kernel(%arg0: i32, %arg1: memref<8x384xf32, #tpu.memory_space<vmem>>, %arg2: memref<8x384xf32, #tpu.memory_space<vmem>>, %arg3: memref<8x384xf32, #tpu.memory_space<vmem>>, %arg4: memref<8x640xf32, #tpu.memory_space<vmem>>) attributes {dimension_semantics = [#tpu.dimension_semantics<parallel>], iteration_bounds = array<i64: 2>, scalar_prefetch = 0 : i64, scratch_operands = 1 : i64, tpu.core_type = #tpu.core_type<tc>, window_params = [{transform_indices = @transform_0, window_bounds = array<i64: 8, 384>}, {transform_indices = @transform_1, window_bounds = array<i64: 8, 384>}, {transform_indices = @transform_2, window_bounds = array<i64: 8, 384>}]} {
    %c0 = arith.constant 0 : index
    %c0_0 = arith.constant 0 : index
    %0 = vector.load %arg1[%c0, %c0_0] : memref<8x384xf32, #tpu.memory_space<vmem>>, vector<8x384xf32>
    %c0_1 = arith.constant 0 : index
    %c128 = arith.constant 128 : index
    %1 = vector.load %arg4[%c0_1, %c128] : memref<8x640xf32, #tpu.memory_space<vmem>>, vector<8x384xf32>
    tpu.vector_store %arg4[%c0_1, %c128], %0 {strides = array<i32>} : memref<8x640xf32, #tpu.memory_space<vmem>>, vector<8x384xf32>,
    %c0_2 = arith.constant 0 : index
    %c0_3 = arith.constant 0 : index
    %2 = vector.load %arg1[%c0_2, %c0_3] : memref<8x384xf32, #tpu.memory_space<vmem>>, vector<8x8xf32>
    %3 = tpu.concatenate %2, %2, %2, %2, %2, %2, %2, %2, %2, %2, %2, %2, %2, %2, %2, %2 in 1 : vector<8x8xf32>, vector<8x8xf32>, vector<8x8xf32>, vector<8x8xf32>, vector<8x8xf32>, vector<8x8xf32>, vector<8x8xf32>, vector<8x8xf32>, vector<8x8xf32>, vector<8x8xf32>, vector<8x8xf32>, vector<8x8xf32>, vector<8x8xf32>, vector<8x8xf32>, vector<8x8xf32>, vector<8x8xf32> -> vector<8x128xf32>
    %c0_4 = arith.constant 0 : index
    %c0_5 = arith.constant 0 : index
    %4 = vector.load %arg4[%c0_4, %c0_5] : memref<8x640xf32, #tpu.memory_space<vmem>>, vector<8x128xf32>
    tpu.vector_store %arg4[%c0_4, %c0_5], %3 {strides = array<i32>} : memref<8x640xf32, #tpu.memory_space<vmem>>, vector<8x128xf32>,
    %c0_6 = arith.constant 0 : index
    %c376 = arith.constant 376 : index
    %5 = vector.load %arg1[%c0_6, %c376] : memref<8x384xf32, #tpu.memory_space<vmem>>, vector<8x8xf32>
    %6 = tpu.concatenate %5, %5, %5, %5, %5, %5, %5, %5, %5, %5, %5, %5, %5, %5, %5, %5 in 1 : vector<8x8xf32>, vector<8x8xf32>, vector<8x8xf32>, vector<8x8xf32>, vector<8x8xf32>, vector<8x8xf32>, vector<8x8xf32>, vector<8x8xf32>, vector<8x8xf32>, vector<8x8xf32>, vector<8x8xf32>, vector<8x8xf32>, vector<8x8xf32>, vector<8x8xf32>, vector<8x8xf32>, vector<8x8xf32> -> vector<8x128xf32>
    %c0_7 = arith.constant 0 : index
    %c512 = arith.constant 512 : index
    %7 = vector.load %arg4[%c0_7, %c512] : memref<8x640xf32, #tpu.memory_space<vmem>>, vector<8x128xf32>
    tpu.vector_store %arg4[%c0_7, %c512], %6 {strides = array<i32>} : memref<8x640xf32, #tpu.memory_space<vmem>>, vector<8x128xf32>,
    %c0_8 = arith.constant 0 : index
    %c0_9 = arith.constant 0 : index
    %8 = vector.load %arg4[%c0_8, %c0_9] : memref<8x640xf32, #tpu.memory_space<vmem>>, vector<8x640xf32>
    %c608_i32 = arith.constant 608 : i32
    %9 = tpu.dynamic_rotate %8 by %c608_i32 dim 1 : vector<8x640xf32>, i32 -> vector<8x640xf32>
    %c632_i32 = arith.constant 632 : i32
    %10 = tpu.dynamic_rotate %8 by %c632_i32 dim 1 : vector<8x640xf32>, i32 -> vector<8x640xf32>
    %11 = arith.addf %8, %10 : vector<8x640xf32>
    %c624_i32 = arith.constant 624 : i32
    %12 = tpu.dynamic_rotate %11 by %c624_i32 dim 1 : vector<8x640xf32>, i32 -> vector<8x640xf32>
    %13 = arith.addf %11, %12 : vector<8x640xf32>
    %c608_i32_10 = arith.constant 608 : i32
    %14 = tpu.dynamic_rotate %13 by %c608_i32_10 dim 1 : vector<8x640xf32>, i32 -> vector<8x640xf32>
    %15 = arith.addf %13, %14 : vector<8x640xf32>
    %c600_i32 = arith.constant 600 : i32
    %16 = tpu.dynamic_rotate %15 by %c600_i32 dim 1 : vector<8x640xf32>, i32 -> vector<8x640xf32>
    %17 = arith.addf %9, %16 : vector<8x640xf32>
    %c576_i32 = arith.constant 576 : i32
    %18 = tpu.dynamic_rotate %15 by %c576_i32 dim 1 : vector<8x640xf32>, i32 -> vector<8x640xf32>
    %19 = arith.addf %15, %18 : vector<8x640xf32>
    %c536_i32 = arith.constant 536 : i32
    %20 = tpu.dynamic_rotate %19 by %c536_i32 dim 1 : vector<8x640xf32>, i32 -> vector<8x640xf32>
    %21 = arith.addf %17, %20 : vector<8x640xf32>
    %22 = vector.extract_strided_slice %21 {offsets = [0, 0], sizes = [8, 384], strides = [1, 1]} : vector<8x640xf32> to vector<8x384xf32>
    %cst = arith.constant 4.000000e-02 : f32
    %23 = vector.broadcast %cst : f32 to vector<8x384xf32>
    %24 = arith.mulf %22, %23 : vector<8x384xf32>
    %c0_11 = arith.constant 0 : index
    %c0_12 = arith.constant 0 : index
    %25 = vector.load %arg1[%c0_11, %c0_12] : memref<8x384xf32, #tpu.memory_space<vmem>>, vector<8x384xf32>
    %c0_13 = arith.constant 0 : index
    %c0_14 = arith.constant 0 : index
    %26 = vector.load %arg3[%c0_13, %c0_14] : memref<8x384xf32, #tpu.memory_space<vmem>>, vector<8x384xf32>
    tpu.vector_store %arg3[%c0_13, %c0_14], %24 {strides = array<i32>} : memref<8x384xf32, #tpu.memory_space<vmem>>, vector<8x384xf32>,
    %27 = arith.subf %25, %24 : vector<8x384xf32>
    %c0_15 = arith.constant 0 : index
    %c0_16 = arith.constant 0 : index
    %28 = vector.load %arg2[%c0_15, %c0_16] : memref<8x384xf32, #tpu.memory_space<vmem>>, vector<8x384xf32>
    tpu.vector_store %arg2[%c0_15, %c0_16], %27 {strides = array<i32>} : memref<8x384xf32, #tpu.memory_space<vmem>>, vector<8x384xf32>,
    return
  }
  func.func @transform_0(%arg0: i32) -> (i32, i32) {
    %c0_i32 = arith.constant 0 : i32
    %c0_i32_0 = arith.constant 0 : i32
    return %arg0, %c0_i32 : i32, i32
  }
  func.func @transform_1(%arg0: i32) -> (i32, i32) {
    %c0_i32 = arith.constant 0 : i32
    %c0_i32_0 = arith.constant 0 : i32
    return %arg0, %c0_i32 : i32, i32
  }
  func.func @transform_2(%arg0: i32) -> (i32, i32) {
    %c0_i32 = arith.constant 0 : i32
    %c0_i32_0 = arith.constant 0 : i32
    return %arg0, %c0_i32 : i32, i32
  }
}

</mosaic_0001>

<bundles_post_ra>
// kernel: tpu_custom_call.1
= control target key start
LH: loop header
LB: loop body
LE: loop exit
PB: predicated region body
PF: predicated region fallthrough
CT: control target
= control target key end

     0   :  { %8 = vsyncpa [#allocation4], 0  ;;  %s1174_s0 = inlined_call_operand.hbm [shape: f32[16,384], index: 0, kind: input, shape index: {}]   ;;  %s1175_s1 = inlined_call_operand.hbm [shape: f32[16,384], index: 1, kind: output, shape index: {0}]   ;;  %s1176_s2 = inlined_call_operand.hbm [shape: f32[16,384], index: 2, kind: output, shape index: {1}]  }
   0x1   :  { %10 = vsyncpa [#allocation4 + $0x1], 0 }
   0x2   :  { %11 = vsyncpa [#allocation5], 0 }
   0x3   :  { %13 = vsyncpa [#allocation5 + $0x1], 0 }
   0x4   :  { %14 = vsyncpa [#allocation8], 0 }
   0x5   :  { %16 = vsyncpa [#allocation8 + $0x1], 0  ;;  %s836_s9 = smov 0   ;;  %s838_s10 = smov 0  }
   0x6   :  { %s840_s11 = smov 0   ;;  %s842_s12 = smov 0  }
   0x7 LB: > { %s857_s13 = sadd.s32 4294967295, %s801_s12   ;;  %s599_s14 = sadd.s32 4294967294, %s801_s12   ;;  %s801_s12 = sphi %s842_s12, %s1192_s12   ;;  %s797_s11 = sphi %s840_s11, %s1191_s11   ;;  %s793_s10 = sphi %s838_s10, %s1190_s10   ;;  %s789_s9 = sphi %s836_s9, %s1189_s9  }
   0x8   : > { %s861_s15 = sadd.s32 1, %s801_s12   ;;  %s29_s16 = sadd.s32 1, %s797_s11 }
   0x9   : > { %s26_s17 = ssub.s32 %s801_s12, %s861_s15  ;;  %p36_p0 = scmp.ne.s32.totalorder %s797_s11, %s793_s10 }
   0xa   : > { %p27_p1 = scmp.eq.s32.totalorder %s26_s17, 0  ;;  %p37_p2 = scmp.eq.s32.totalorder %s801_s12, 0 }
   0xb   : > { %p42_p3 = scmp.ne.s32.totalorder %s793_s10, %s789_s9  ;;  %p43_p4 = scmp.eq.s32.totalorder %s857_s13, 0 }
   0xc   : > { %s873_s18 = scalar_select %p27_p1, %s797_s11, %s29_s16  }
   0xd   : > { %p38_p5 = por %p37_p2, %p36_p0  ;;  %p875_p6 = por %p43_p4, %p42_p3 }
   0xe   : > { %p66_p7 = scmp.eq.s32.totalorder %s857_s13, 1  ;;  %p72_p8 = scmp.eq.s32.totalorder %s599_s14, 1 }
   0xf   : > { %s1179_s19 = scalar_select %p875_p6, 1, 0 }
  0x10   : > { %p630_p10 = scmp.lt.s32.totalorder %s801_s12, 2  ;;  %p882_p11 = por %p66_p7, %p36_p0 }
  0x11   : > { %p886_p12 = por %p72_p8, %p42_p3  ;;  %s118_s22 = sand.u32 1, %s797_s11  }
  0x12   : > { %s1180_s20 = scalar_select %p882_p11, 1, 0 }
  0x13   : > { %s1181_s21 = scalar_select %p886_p12, 1, 0 }
  0x14   : > { %s609_s23 = smul.u32 384, %s801_s12  ;;  %p897_p13 = pnand %p630_p10, %p38_p5 }
  0x15   : > { %s608_s24 = smul.u32 24, %s118_s22  ;;  %s119_s3 = scalar_lea.sflag [#allocation4], %s118_s22 }
  0x16   : > { %s895_s27 = scalar_lea.hbm %s1174_s0, %s609_s23  ;;  %p681_p3 = pneg %p897_p13 }
  0x17   : > { %s122_s29 = scalar_lea.vmem [#allocation3], %s608_s24  ;;  %s679_s4 = scalar_lea.hbm %s895_s27, 384 }
  0x18   : > { %s130_s30 = sshll.u32 %s122_s29, 4  ;;  %p680_p2 = scmp.ne.s32.totalorder %s895_s27, %s679_s4  ;;  %s131_s30 = int_to_ptr.vmem [resolvable:$true] %s130_s30 }
  0x19   : > { %s684_s7 = scalar_lea.hbm %s1174_s0, 768  ;;  %p685_p5 = scmp.lt.s32.totalorder %s895_s27, %s1174_s0 }
  0x1a   : > { %p682_p4 = pnand %p681_p3, %p680_p2  ;;  %p686_p8 = scmp.lt.s32.totalorder %s684_s7, %s679_s4 }
  0x1c   : > { %p683_p7 = pneg %p682_p4  ;;  %p687_p10 = por %p686_p8, %p685_p5 }
  0x1e   : > { %p688_p9 = pnand %p687_p10, %p683_p7 }
  0x20   : > { %691 = shalt.err (!%p688_p9)
}
  0x21   : > { %s692_s16 = scalar_lea.vmem %s131_s30, 384  ;;  %s803_s17 = smov [#allocation3]  }
  0x22   : > { %p693_p0 = scmp.ne.s32.totalorder %s131_s30, %s692_s16  ;;  %s697_s22 = sshll.u32 %s803_s17, 4  ;;  %s698_s22 = int_to_ptr.vmem [resolvable:$false] %s697_s22 }
  0x23   : > { %s699_s23 = scalar_lea.vmem %s698_s22, 768  ;;  %p700_p2 = scmp.lt.s32.totalorder %s131_s30, %s698_s22 }
  0x24   : > { %p695_p1 = pnand %p693_p0, %p681_p3  ;;  %p701_p4 = scmp.lt.s32.totalorder %s699_s23, %s692_s16 }
  0x26   : > { %p696_p12 = pneg %p695_p1  ;;  %p702_p11 = por %p701_p4, %p700_p2 }
  0x28   : > { %p703_p6 = pnand %p702_p11, %p696_p12 }
  0x2a   : > { %706 = shalt.err (!%p703_p6)
}
  0x2b   : > { %622 = dma.hbm_to_vmem [thread:$0]  (!%p897_p13), %s895_s27, 384, %s131_s30, %s119_s3  }
  0x2c   : > { %p1183_p9 = scmp.lt.s32.totalorder %s801_s12, 3  ;;  %p1184_p7 = scmp.ge.s32.totalorder %s801_s12, 1 }
  0x2e   : > { %p136_p5 = pnand %p1184_p7, %p1183_p9 }
  0x2f   : > { %s922_s24 = sand.u32 (!%p136_p5), 1, %s793_s10   ;;  %p1185_p6 = scmp.ne.s32.totalorder (!%p136_p5), %s1179_s19, 0 }
  0x30   : > { %139 = sbr.rel (%p136_p5) target bundleno = 862 (0x35e), region = 24  ;;  %s142_s26 = scalar_lea.sflag (!%p136_p5), [#allocation4], %s922_s24 }
  0x31   : > { %s925_s25 = smul.u32 (!%p136_p5), 24, %s922_s24 }
  0x33   : > { %s929_s29 = scalar_lea.vmem (!%p136_p5), [#allocation3], %s925_s25 }
  0x35   : > { %776 = dma.done.wait (%p1185_p6), %s142_s26, 384  }
  0x36   : > { %778 = vsyncadd (%p1185_p6), %s142_s26, 4294966912  ;;  %v936_v0 = vld [vmem:[%s929_s29 + $0x10] sm:$0xff]  ;;  %v939_v1 = vld [vmem:[%s929_s29] sm:$0xff]  ;;  %s804_s27 = smov 16   ;;  %s805_s28 = smov 8   ;;  %vm224_vm0 = vcmask 64512   ;;  %v331_v43 = vlaneseq }
  0x37   : > { %260 = vrot.lane.b32.xlu1 %v936_v0, %s804_s27  ;;  %179 = vrot.lane.b32.xlu0 %v939_v1, %s805_s28  ;;  %s806_s30 = smov 24   ;;  %s807_s19 = smov 32   ;;  %v984_v2 = vld [vmem:[%s929_s29 + $0x8] sm:$0xff]  ;;  %vm226_vm1 = vcmask 130048   ;;  %vm228_vm2 = vcmask 195584   ;;  %vm230_vm3 = vcmask 261120  }
  0x38   : > { %s808_s3 = smov 40   ;;  %s809_s4 = smov 48   ;;  %vm232_vm4 = vcmask 326656   ;;  %vm234_vm5 = vcmask 392192   ;;  %vm236_vm6 = vcmask 457728   ;;  %vm238_vm7 = vcmask 523264  }
  0x39   : > { %s810_s5 = smov 56   ;;  %s811_s6 = smov 64   ;;  %vm240_vm8 = vcmask 588800   ;;  %vm242_vm9 = vcmask 654336   ;;  %vm244_vm10 = vcmask 719872   ;;  %vm246_vm11 = vcmask 785408  }
  0x3a   : > { %s812_s7 = smov 72   ;;  %s813_s8 = smov 80   ;;  %vm248_vm12 = vcmask 850944   ;;  %vm250_vm13 = vcmask 916480   ;;  %vm252_vm14 = vcmask 982016   ;;  %v1004_v54 = vand.u32 127, %v331_v43 }
  0x3b   : > { %182 = vrot.lane.b32.xlu1 %v939_v1, %s804_s27  ;;  %257 = vrot.lane.b32.xlu0 %v936_v0, %s805_s28  ;;  %s814_s14 = smov 88   ;;  %s815_s16 = smov 96  }
  0x3c   : > { %s816_s17 = smov 104   ;;  %s817_s22 = smov 112   ;;  %vm347_vm15 = vcmp.lt.s32.totalorder %v1004_v54, 120 }
  0x3d   : > { %s818_s23 = smov 120   ;;  %s611_s26 = smul.u32 384, %s857_s13 }
  0x3e   : > { %s170_s29 = scalar_lea.vmem [#allocation7], %s925_s25  ;;  %s1092_s28 = scalar_lea.vmem [#allocation6], %s925_s25 }
  0x3f   : > { %185 = vrot.lane.b32.xlu1 %v939_v1, %s806_s30  ;;  %263 = vrot.lane.b32.xlu0 %v936_v0, %s806_s30  ;;  %s497_s27 = sshll.u32 %s170_s29, 4  ;;  %s483_s13 = sshll.u32 %s1092_s28, 4  ;;  %s1101_s27 = int_to_ptr.vmem [resolvable:$true] %s497_s27  ;;  %s1110_s13 = int_to_ptr.vmem [resolvable:$true] %s483_s13 }
  0x40   : > { %p1186_p12 = scmp.ne.s32.totalorder %s1180_s20, 0 }
  0x43   : > { %188 = vrot.lane.b32.xlu1 %v939_v1, %s807_s19  ;;  %266 = vrot.lane.b32.xlu0 %v936_v0, %s807_s19 }
  0x47   : > { %191 = vrot.lane.b32.xlu1 %v939_v1, %s808_s3  ;;  %269 = vrot.lane.b32.xlu0 %v936_v0, %s808_s3  ;;  %s1099_s3 = scalar_lea.hbm %s1176_s2, %s611_s26 }
  0x4b   : > { %194 = vrot.lane.b32.xlu1 %v939_v1, %s809_s4  ;;  %272 = vrot.lane.b32.xlu0 %v936_v0, %s809_s4 }
  0x4f   : > { %197 = vrot.lane.b32.xlu1 %v939_v1, %s810_s5  ;;  %275 = vrot.lane.b32.xlu0 %v936_v0, %s810_s5  ;;  %s1108_s5 = scalar_lea.hbm %s1175_s1, %s611_s26 }
  0x53   : > { %200 = vrot.lane.b32.xlu1 %v939_v1, %s811_s6  ;;  %278 = vrot.lane.b32.xlu0 %v936_v0, %s811_s6 }
  0x57   : > { %203 = vrot.lane.b32.xlu1 %v939_v1, %s812_s7  ;;  %281 = vrot.lane.b32.xlu0 %v936_v0, %s812_s7  ;;  %s707_s7 = scalar_lea.vmem %s1101_s27, 384 }
  0x58   : > { %p708_p11 = scmp.ne.s32.totalorder %s1101_s27, %s707_s7 }
  0x5a   : > { %p709_p13 = pnand %p708_p11, %p1186_p12 }
  0x5b   : > { %206 = vrot.lane.b32.xlu1 %v939_v1, %s813_s8  ;;  %284 = vrot.lane.b32.xlu0 %v936_v0, %s813_s8  ;;  %s819_s8 = smov [#allocation7]  }
  0x5c   : > { %p710_p0 = pneg %p709_p13 }
  0x5f   : > { %209 = vrot.lane.b32.xlu1 %v939_v1, %s814_s14  ;;  %287 = vrot.lane.b32.xlu0 %v936_v0, %s814_s14 }
  0x63   : > { %212 = vrot.lane.b32.xlu1 %v939_v1, %s815_s16  ;;  %290 = vrot.lane.b32.xlu0 %v936_v0, %s815_s16 }
  0x67   : > { %215 = vrot.lane.b32.xlu1 %v939_v1, %s816_s17  ;;  %293 = vrot.lane.b32.xlu0 %v936_v0, %s816_s17 }
  0x6b   : > { %218 = vrot.lane.b32.xlu1 %v939_v1, %s817_s22  ;;  %296 = vrot.lane.b32.xlu0 %v936_v0, %s817_s22 }
  0x6f   : > { %221 = vrot.lane.b32.xlu1 %v939_v1, %s818_s23  ;;  %299 = vrot.lane.b32.xlu0 %v936_v0, %s818_s23 }
  0x73   : > { %339 = vrot.lane.b32.xlu1 %v939_v1, %s818_s23  ;;  %341 = vrot.lane.b32.xlu0 %v984_v2, %s818_s23 }
  0x77   : > { %343 = vrot.lane.b32.xlu1 %v936_v0, %s818_s23 }
  0xa9   : > { %v261_v3 = vpop.permute.xlu1 %260  ;;  %v180_v4 = vpop.permute.xlu0 %179 }
  0xaa   : > { %v225_v25 = vsel %vm224_vm0, %v939_v1, %v180_v4 }
  0xad   : > { %v183_v5 = vpop.permute.xlu1 %182  ;;  %v258_v6 = vpop.permute.xlu0 %257 }
  0xae   : > { %v227_v26 = vsel %vm226_vm1, %v225_v25, %v183_v5  ;;  %v302_v29 = vsel %vm224_vm0, %v258_v6, %v261_v3  ;;  %vm368_vm0 = vcmp.lt.s32.totalorder %v1004_v54, 112 }
  0xb1   : > { %v186_v7 = vpop.permute.xlu1 %185  ;;  %v264_v8 = vpop.permute.xlu0 %263 }
  0xb2   : > { %v229_v30 = vsel %vm228_vm2, %v227_v26, %v186_v7  ;;  %v303_v31 = vsel %vm226_vm1, %v302_v29, %v264_v8  ;;  %vm333_vm1 = vcmp.lt.s32.totalorder %v1004_v54, 96 }
  0xb5   : > { %v189_v9 = vpop.permute.xlu1 %188  ;;  %v267_v10 = vpop.permute.xlu0 %266 }
  0xb6   : > { %v231_v32 = vsel %vm230_vm3, %v229_v30, %v189_v9  ;;  %v304_v33 = vsel %vm228_vm2, %v303_v31, %v267_v10  ;;  %vm424_vm2 = vcmp.lt.s32.totalorder %v1004_v54, 64 }
  0xb9   : > { %v192_v11 = vpop.permute.xlu1 %191  ;;  %v270_v12 = vpop.permute.xlu0 %269 }
  0xba   : > { %v233_v34 = vsel %vm232_vm4, %v231_v32, %v192_v11  ;;  %v305_v35 = vsel %vm230_vm3, %v304_v33, %v270_v12  ;;  %vm407_vm3 = vcmp.lt.s32.totalorder %v1004_v54, 88 }
  0xbd   : > { %v195_v13 = vpop.permute.xlu1 %194  ;;  %v273_v14 = vpop.permute.xlu0 %272 }
  0xbe   : > { %v235_v36 = vsel %vm234_vm5, %v233_v34, %v195_v13  ;;  %v306_v39 = vsel %vm232_vm4, %v305_v35, %v273_v14  ;;  %vm441_vm4 = vcmp.lt.s32.totalorder %v1004_v54, 24 }
  0xc1   : > { %v198_v15 = vpop.permute.xlu1 %197  ;;  %v276_v16 = vpop.permute.xlu0 %275 }
  0xc2   : > { %v237_v40 = vsel %vm236_vm6, %v235_v36, %v198_v15  ;;  %v307_v41 = vsel %vm234_vm5, %v306_v39, %v276_v16 }
  0xc5   : > { %v201_v17 = vpop.permute.xlu1 %200  ;;  %v279_v18 = vpop.permute.xlu0 %278 }
  0xc6   : > { %v239_v42 = vsel %vm238_vm7, %v237_v40, %v201_v17  ;;  %v308_v44 = vsel %vm236_vm6, %v307_v41, %v279_v18 }
  0xc9   : > { %v204_v19 = vpop.permute.xlu1 %203  ;;  %v282_v20 = vpop.permute.xlu0 %281 }
  0xca   : > { %v241_v45 = vsel %vm240_vm8, %v239_v42, %v204_v19  ;;  %v309_v46 = vsel %vm238_vm7, %v308_v44, %v282_v20 }
  0xcd   : > { %v207_v21 = vpop.permute.xlu1 %206  ;;  %v285_v22 = vpop.permute.xlu0 %284 }
  0xce   : > { %v243_v47 = vsel %vm242_vm9, %v241_v45, %v207_v21  ;;  %v310_v50 = vsel %vm240_vm8, %v309_v46, %v285_v22 }
  0xd1   : > { %v210_v23 = vpop.permute.xlu1 %209  ;;  %v288_v24 = vpop.permute.xlu0 %287 }
  0xd2   : > { %v245_v51 = vsel %vm244_vm10, %v243_v47, %v210_v23  ;;  %v311_v52 = vsel %vm242_vm9, %v310_v50, %v288_v24 }
  0xd5   : > { %v213_v27 = vpop.permute.xlu1 %212  ;;  %v291_v28 = vpop.permute.xlu0 %290 }
  0xd6   : > { %v247_v53 = vsel %vm246_vm11, %v245_v51, %v213_v27  ;;  %v312_v55 = vsel %vm244_vm10, %v311_v52, %v291_v28 }
  0xd9   : > { %v216_v37 = vpop.permute.xlu1 %215  ;;  %v294_v38 = vpop.permute.xlu0 %293 }
  0xda   : > { %v249_v56 = vsel %vm248_vm12, %v247_v53, %v216_v37  ;;  %v313_v57 = vsel %vm246_vm11, %v312_v55, %v294_v38 }
  0xdd   : > { %v219_v48 = vpop.permute.xlu1 %218  ;;  %v297_v49 = vpop.permute.xlu0 %296 }
  0xde   : > { %v251_v58 = vsel %vm250_vm13, %v249_v56, %v219_v48  ;;  %v314_v61 = vsel %vm248_vm12, %v313_v57, %v297_v49 }
  0xe1   : > { %v222_v59 = vpop.permute.xlu1 %221  ;;  %v300_v60 = vpop.permute.xlu0 %299 }
  0xe2   : > { %v1009_v62 = vsel %vm252_vm14, %v251_v58, %v222_v59  ;;  %v315_v63 = vsel %vm250_vm13, %v314_v61, %v300_v60 }
  0xe3   : > { %337 = vrot.lane.b32.xlu0 %v1009_v62, %s818_s23  ;;  %v316_v5 = vsel %vm252_vm14, %v315_v63, %v936_v0 }
  0xe5   : > { %v340_v3 = vpop.permute.xlu1 %339  ;;  %v342_v4 = vpop.permute.xlu0 %341 }
  0xe6   : > { %v350_v6 = vsel %vm347_vm15, %v340_v3, %v342_v4 }
  0xe7   : > { %345 = vrot.lane.b32.xlu0 %v316_v5, %s818_s23  ;;  %v354_v7 = vadd.f32 %v350_v6, %v939_v1 }
  0xe9   : > { %v344_v8 = vpop.permute.xlu1 %343 }
  0xea   : > { %v349_v9 = vsel %vm347_vm15, %v342_v4, %v344_v8 }
  0xeb   : > { %v355_v10 = vadd.f32 %v349_v9, %v984_v2  ;;  %360 = vrot.lane.b32.xlu0 %v354_v7, %s817_s22 }
  0xed   : > { %362 = vrot.lane.b32.xlu1 %v355_v10, %s817_s22 }
 0x155   : > { %v338_v11 = vpop.permute.xlu0 %337 }
 0x156   : > { %v351_v12 = vsel %vm347_vm15, %v338_v11, %v340_v3 }
 0x157   : > { %v353_v13 = vadd.f32 %v351_v12, %v1009_v62 }
 0x159   : > { %v346_v14 = vpop.permute.xlu0 %345  ;;  %358 = vrot.lane.b32.xlu1 %v353_v13, %s817_s22 }
 0x15a   : > { %v348_v15 = vsel %vm347_vm15, %v344_v8, %v346_v14  ;;  %v352_v16 = vsel %vm347_vm15, %v346_v14, %v338_v11 }
 0x15b   : > { %v356_v17 = vadd.f32 %v348_v15, %v936_v0  ;;  %v357_v18 = vadd.f32 %v352_v16, %v316_v5 }
 0x15d   : > { %366 = vrot.lane.b32.xlu1 %v357_v18, %s817_s22  ;;  %364 = vrot.lane.b32.xlu0 %v356_v17, %s817_s22  ;;  %v361_v19 = vpop.permute.xlu0 %360 }
 0x15f   : > { %v363_v20 = vpop.permute.xlu1 %362 }
 0x160   : > { %v371_v21 = vsel %vm368_vm0, %v361_v19, %v363_v20 }
 0x161   : > { %v375_v22 = vadd.f32 %v371_v21, %v354_v7 }
 0x163   : > { %381 = vrot.lane.b32.xlu1 %v375_v22, %s815_s16 }
 0x1cb   : > { %v359_v23 = vpop.permute.xlu1 %358 }
 0x1cc   : > { %v372_v24 = vsel %vm368_vm0, %v359_v23, %v361_v19 }
 0x1cd   : > { %v374_v25 = vadd.f32 %v372_v24, %v353_v13 }
 0x1cf   : > { %v367_v26 = vpop.permute.xlu1 %366  ;;  %379 = vrot.lane.b32.xlu0 %v374_v25, %s815_s16  ;;  %v365_v27 = vpop.permute.xlu0 %364 }
 0x1d0   : > { %v369_v28 = vsel %vm368_vm0, %v365_v27, %v367_v26  ;;  %v370_v29 = vsel %vm368_vm0, %v363_v20, %v365_v27  ;;  %v373_v32 = vsel %vm368_vm0, %v367_v26, %v359_v23 }
 0x1d1   : > { %v376_v30 = vadd.f32 %v370_v29, %v355_v10  ;;  %v377_v31 = vadd.f32 %v369_v28, %v356_v17  ;;  %v378_v33 = vadd.f32 %v373_v32, %v357_v18 }
 0x1d3   : > { %383 = vrot.lane.b32.xlu0 %v376_v30, %s815_s16  ;;  %385 = vrot.lane.b32.xlu1 %v377_v31, %s815_s16 }
 0x1d5   : > { %v382_v34 = vpop.permute.xlu1 %381 }
 0x1d7   : > { %387 = vrot.lane.b32.xlu0 %v378_v33, %s815_s16 }
 0x241   : > { %v380_v35 = vpop.permute.xlu0 %379 }
 0x242   : > { %v392_v36 = vsel %vm333_vm1, %v380_v35, %v382_v34 }
 0x243   : > { %v394_v37 = vadd.f32 %v392_v36, %v374_v25 }
 0x245   : > { %v386_v38 = vpop.permute.xlu1 %385  ;;  %414 = vrot.lane.b32.xlu1 %v394_v37, %s811_s6  ;;  %v384_v39 = vpop.permute.xlu0 %383 }
 0x246   : > { %v390_v40 = vsel %vm333_vm1, %v384_v39, %v386_v38  ;;  %v391_v41 = vsel %vm333_vm1, %v382_v34, %v384_v39 }
 0x247   : > { %v395_v42 = vadd.f32 %v391_v41, %v375_v22  ;;  %v396_v43 = vadd.f32 %v390_v40, %v376_v30 }
 0x249   : > { %416 = vrot.lane.b32.xlu0 %v395_v42, %s811_s6  ;;  %418 = vrot.lane.b32.xlu1 %v396_v43, %s811_s6  ;;  %v388_v44 = vpop.permute.xlu0 %387 }
 0x24a   : > { %v389_v45 = vsel %vm333_vm1, %v386_v38, %v388_v44  ;;  %v393_v46 = vsel %vm333_vm1, %v388_v44, %v380_v35 }
 0x24b   : > { %v397_v47 = vadd.f32 %v389_v45, %v377_v31  ;;  %v398_v48 = vadd.f32 %v393_v46, %v378_v33 }
 0x24d   : > { %422 = vrot.lane.b32.xlu1 %v398_v48, %s811_s6  ;;  %420 = vrot.lane.b32.xlu0 %v397_v47, %s811_s6  ;;  %s469_s6 = scalar_lea.sflag [#allocation8], %s922_s24 }
 0x251   : > { %325 = vrot.lane.b32.xlu1 %v939_v1, %s815_s16  ;;  %323 = vrot.lane.b32.xlu0 %v1009_v62, %s815_s16 }
 0x255   : > { %329 = vrot.lane.b32.xlu1 %v936_v0, %s815_s16  ;;  %327 = vrot.lane.b32.xlu0 %v984_v2, %s815_s16 }
 0x259   : > { %401 = vrot.lane.b32.xlu1 %v395_v42, %s814_s14  ;;  %399 = vrot.lane.b32.xlu0 %v394_v37, %s814_s14 }
 0x25d   : > { %405 = vrot.lane.b32.xlu1 %v397_v47, %s814_s14  ;;  %403 = vrot.lane.b32.xlu0 %v396_v43, %s814_s14  ;;  %s711_s14 = sshll.u32 %s819_s8, 4  ;;  %s712_s14 = int_to_ptr.vmem [resolvable:$false] %s711_s14 }
 0x25e   : > { %s713_s16 = scalar_lea.vmem %s712_s14, 768  ;;  %p714_p1 = scmp.lt.s32.totalorder %s1101_s27, %s712_s14 }
 0x25f   : > { %p715_p3 = scmp.lt.s32.totalorder %s713_s16, %s707_s7 }
 0x261   : > { %p716_p8 = por %p715_p3, %p714_p1 }
 0x263   : > { %p717_p10 = pnand %p716_p8, %p710_p0 }
 0x2b7   : > { %v415_v49 = vpop.permute.xlu1 %414 }
 0x2bb   : > { %v419_v50 = vpop.permute.xlu1 %418  ;;  %v417_v51 = vpop.permute.xlu0 %416 }
 0x2bc   : > { %v427_v52 = vsel %vm424_vm2, %v417_v51, %v419_v50  ;;  %v428_v53 = vsel %vm424_vm2, %v415_v49, %v417_v51 }
 0x2bd   : > { %v429_v55 = vadd.f32 %v428_v53, %v394_v37  ;;  %v430_v56 = vadd.f32 %v427_v52, %v395_v42 }
 0x2bf   : > { %v423_v57 = vpop.permute.xlu1 %422  ;;  %433 = vrot.lane.b32.xlu0 %v429_v55, %s806_s30  ;;  %435 = vrot.lane.b32.xlu1 %v430_v56, %s806_s30  ;;  %v421_v58 = vpop.permute.xlu0 %420 }
 0x2c0   : > { %v425_v59 = vsel %vm424_vm2, %v421_v58, %v423_v57  ;;  %v426_v60 = vsel %vm424_vm2, %v419_v50, %v421_v58 }
 0x2c1   : > { %v431_v61 = vadd.f32 %v426_v60, %v396_v43  ;;  %v432_v62 = vadd.f32 %v425_v59, %v397_v47 }
 0x2c3   : > { %437 = vrot.lane.b32.xlu0 %v431_v61, %s806_s30  ;;  %439 = vrot.lane.b32.xlu1 %v432_v62, %s806_s30  ;;  %v326_v63 = vpop.permute.xlu1 %325  ;;  %v324_v3 = vpop.permute.xlu0 %323 }
 0x2c4   : > { %v336_v11 = vsel %vm333_vm1, %v324_v3, %v326_v63 }
 0x2c7   : > { %v330_v4 = vpop.permute.xlu1 %329  ;;  %v328_v5 = vpop.permute.xlu0 %327 }
 0x2c8   : > { %v334_v12 = vsel %vm333_vm1, %v328_v5, %v330_v4  ;;  %v335_v16 = vsel %vm333_vm1, %v326_v63, %v328_v5 }
 0x2cb   : > { %v402_v6 = vpop.permute.xlu1 %401  ;;  %v400_v7 = vpop.permute.xlu0 %399 }
 0x2cc   : > { %v410_v10 = vsel %vm407_vm3, %v400_v7, %v402_v6 }
 0x2cd   : > { %v411_v13 = vadd.f32 %v410_v10, %v336_v11 }
 0x2cf   : > { %v406_v8 = vpop.permute.xlu1 %405  ;;  %v404_v9 = vpop.permute.xlu0 %403 }
 0x2d0   : > { %v408_v17 = vsel %vm407_vm3, %v404_v9, %v406_v8  ;;  %v409_v18 = vsel %vm407_vm3, %v402_v6, %v404_v9 }
 0x2d1   : > { %v412_v21 = vadd.f32 %v409_v18, %v335_v16  ;;  %v413_v22 = vadd.f32 %v408_v17, %v334_v12 }
 0x331   : > { %v436_v14 = vpop.permute.xlu1 %435  ;;  %v434_v15 = vpop.permute.xlu0 %433 }
 0x332   : > { %v444_v19 = vsel %vm441_vm4, %v434_v15, %v436_v14 }
 0x333   : > { %v445_v20 = vadd.f32 %v444_v19, %v411_v13 }
 0x335   : > { %v448_v23 = vmul.f32 0.04, %v445_v20  ;;  %v440_v24 = vpop.permute.xlu1 %439  ;;  %v438_v25 = vpop.permute.xlu0 %437 }
 0x336   : > { %v442_v26 = vsel %vm441_vm4, %v438_v25, %v440_v24  ;;  %v443_v27 = vsel %vm441_vm4, %v436_v14, %v438_v25 }
 0x337   : > { %454 = vst [vmem:[%s170_s29] sm:$0xff] %v448_v23  ;;  %v457_v28 = vsub.f32 %v939_v1, %v448_v23  ;;  %v446_v29 = vadd.f32 %v443_v27, %v412_v21  ;;  %v447_v30 = vadd.f32 %v442_v26, %v413_v22 }
 0x339   : > { %460 = vst [vmem:[%s1092_s28] sm:$0xff] %v457_v28  ;;  %v449_v31 = vmul.f32 0.04, %v446_v29  ;;  %v450_v32 = vmul.f32 0.04, %v447_v30 }
 0x33b   : > { %455 = vst [vmem:[%s170_s29 + $0x8] sm:$0xff] %v449_v31  ;;  %456 = vst [vmem:[%s170_s29 + $0x10] sm:$0xff] %v450_v32  ;;  %v458_v1 = vsub.f32 %v984_v2, %v449_v31  ;;  %v459_v54 = vsub.f32 %v936_v0, %v450_v32 }
 0x33c   : > { %720 = shalt.err (!%p717_p10)
}
 0x33d   : > { %s721_s17 = scalar_lea.hbm %s1099_s3, 384  ;;  %s725_s26 = scalar_lea.hbm %s1176_s2, 768 }
 0x33e   : > { %p722_p2 = scmp.ne.s32.totalorder %s1099_s3, %s721_s17  ;;  %p726_p7 = scmp.lt.s32.totalorder %s1099_s3, %s1176_s2 }
 0x33f   : > { %p727_p5 = scmp.lt.s32.totalorder %s725_s26, %s721_s17 }
 0x340   : > { %p723_p4 = pnand %p722_p2, %p1186_p12 }
 0x341   : > { %p728_p6 = por %p727_p5, %p726_p7 }
 0x342   : > { %p724_p9 = pneg %p723_p4 }
 0x344   : > { %p729_p11 = pnand %p728_p6, %p724_p9 }
 0x346   : > { %732 = shalt.err (!%p729_p11)
}
 0x347   : > { %616 = dma.vmem_to_hbm [thread:$0]  (%p1186_p12), %s1101_s27, 384, %s1099_s3, %s469_s6   ;;  %461 = vst [vmem:[%s1092_s28 + $0x8] sm:$0xff] %v458_v1  ;;  %462 = vst [vmem:[%s1092_s28 + $0x10] sm:$0xff] %v459_v54 }
 0x348   : > { %s464_s19 = scalar_lea.sflag [#allocation5], %s922_s24  ;;  %s733_s25 = scalar_lea.vmem %s1110_s13, 384 }
 0x349   : > { %p734_p13 = scmp.ne.s32.totalorder %s1110_s13, %s733_s25  ;;  %s820_s4 = smov [#allocation6]  }
 0x34a   : > { %s737_s7 = sshll.u32 %s820_s4, 4  ;;  %s738_s7 = int_to_ptr.vmem [resolvable:$false] %s737_s7 }
 0x34b   : > { %p735_p0 = pnand %p734_p13, %p1186_p12  ;;  %s739_s8 = scalar_lea.vmem %s738_s7, 768 }
 0x34c   : > { %p740_p3 = scmp.lt.s32.totalorder %s1110_s13, %s738_s7  ;;  %p741_p8 = scmp.lt.s32.totalorder %s739_s8, %s733_s25 }
 0x34d   : > { %p736_p1 = pneg %p735_p0 }
 0x34e   : > { %p742_p10 = por %p741_p8, %p740_p3 }
 0x350   : > { %p743_p2 = pnand %p742_p10, %p736_p1 }
 0x352   : > { %746 = shalt.err (!%p743_p2)
}
 0x353   : > { %s747_s27 = scalar_lea.hbm %s1108_s5, 384  ;;  %s751_s3 = scalar_lea.hbm %s1175_s1, 768 }
 0x354   : > { %p748_p4 = scmp.ne.s32.totalorder %s1108_s5, %s747_s27  ;;  %p752_p5 = scmp.lt.s32.totalorder %s1108_s5, %s1175_s1 }
 0x355   : > { %p753_p6 = scmp.lt.s32.totalorder %s751_s3, %s747_s27 }
 0x356   : > { %p749_p9 = pnand %p748_p4, %p1186_p12 }
 0x357   : > { %p754_p11 = por %p753_p6, %p752_p5 }
 0x358   : > { %p750_p7 = pneg %p749_p9 }
 0x35a   : > { %p755_p13 = pnand %p754_p11, %p750_p7 }
 0x35c   : > { %758 = shalt.err (!%p755_p13)
}
 0x35d   : > { %615 = dma.vmem_to_hbm [thread:$0]  (%p1186_p12), %s1110_s13, 384, %s1108_s5, %s464_s19  }
 0x35e PF: > { %s509_s16 = sand.u32 1, %s789_s9   ;;  %p1187_p0 = scmp.ne.s32.totalorder %s1181_s21, 0 }
 0x35f   : > { %p1188_p1 = scmp.ge.s32.totalorder %s801_s12, 2  ;;  %s510_s17 = scalar_lea.sflag [#allocation5], %s509_s16 }
 0x361   : > { %p624_p3 = pnand %p1188_p1, %p1187_p0 }
 0x363   : > { %p625_p8 = pneg %p624_p3 }
 0x365   : > { %780 = dma.done.wait (%p625_p8), %s510_s17, 384  }
 0x366   : > { %782 = vsyncadd (%p625_p8), %s510_s17, 4294966912  ;;  %s519_s22 = scalar_lea.sflag [#allocation8], %s509_s16 }
 0x367   : > { %784 = dma.done.wait (%p625_p8), %s519_s22, 384  }
 0x368   : > { %786 = vsyncadd (%p625_p8), %s519_s22, 4294966912  ;;  %p19_p12 = scmp.ge.s32.totalorder %s861_s15, 4   ;;  %s1189_s9 = smov %s793_s10 }
 0x369   : > { %s1190_s10 = smov %s797_s11  ;;  %s1191_s11 = smov %s873_s18 }
 0x36a   : > { %s1192_s12 = smov %s861_s15  ;;  %21 = sbr.rel (!%p19_p12) target bundleno = 7 (0x7), region = 86 }
 0x36f   :  { %524 = vsyncpa [#allocation4], 1 }
 0x370   :  { %526 = vsyncpa [#allocation4 + $0x1], 1 }
 0x371   :  { %527 = vsyncpa [#allocation5], 1 }
 0x372   :  { %529 = vsyncpa [#allocation5 + $0x1], 1 }
 0x373   :  { %530 = vsyncpa [#allocation8], 1 }
 0x374   :  { %532 = vsyncpa [#allocation8 + $0x1], 1 }

</bundles_post_ra>
